<compile_context>
chip_gen: v5e
topology: v5e:2x2
jax: 0.10.0
libtpu: 0.0.40
codegen_flags: <defaults>
</compile_context>

<pallas_src>
import math

import jax
import jax.numpy as jnp
from jax.experimental import pallas as pl
from jax.experimental.pallas import tpu as pltpu

SUBLANE_BF16 = 16  # rows per packed bf16 sublane group (safe for f32 too)


def _round_up(x, m):
    return ((x + m - 1) // m) * m


def dqn_kernel(x_ref, w1_ref, b1_ref, w2_ref, b2_ref, w3_ref, b3_ref, o_ref):
    """One batch tile of the fused 3-layer MLP.

    x_ref  : [TB, D]    f32 (cast to the weight dtype for the MXU)
    w*_ref : [in, out]  f32 or bf16        b*_ref : [1, out] f32
    o_ref  : [TB, A]    f32
    """
    mx = w1_ref.dtype
    x = x_ref[...].astype(mx)

    # fc1 + ReLU (MXU matmul with f32 accumulation; bias/ReLU on the VPU)
    h1 = jnp.dot(x, w1_ref[...], preferred_element_type=jnp.float32) + b1_ref[...]
    h1 = jnp.maximum(h1, 0.0)

    # fc2 + ReLU
    h2 = jnp.dot(h1.astype(mx), w2_ref[...], preferred_element_type=jnp.float32) + b2_ref[...]
    h2 = jnp.maximum(h2, 0.0)

    # fc3 (linear head)
    out = jnp.dot(h2.astype(mx), w3_ref[...], preferred_element_type=jnp.float32) + b3_ref[...]
    o_ref[...] = out.astype(o_ref.dtype)


def prepare_params(params, compute_dtype=jnp.float32):
    """One-time preprocessing (do NOT call per forward): cast weights to the MXU
    compute dtype and reshape biases to [1, out] f32.  Weights are stored
    [in, out] (transpose of PyTorch nn.Linear) so the kernel does x @ W."""
    def w(a):
        return jnp.asarray(a, compute_dtype)

    def b(a):
        return jnp.asarray(a, jnp.float32).reshape(1, -1)

    return {"w1": w(params["w1"]), "b1": b(params["b1"]),
            "w2": w(params["w2"]), "b2": b(params["b2"]),
            "w3": w(params["w3"]), "b3": b(params["b3"])}


def dqn_forward(state, prepped, *, batch_tile=1024):
    """Fused DQN forward.

    state   : [B, D_in] float32
    prepped : output of prepare_params()
    Returns [B, n_actions] float32.
    """
    w1, b1 = prepped["w1"], prepped["b1"]
    w2, b2 = prepped["w2"], prepped["b2"]
    w3, b3 = prepped["w3"], prepped["b3"]

    B, D = state.shape
    H1, H2, A = w1.shape[1], w2.shape[1], w3.shape[1]

    # Batch tile: multiple of 16 (bf16 sublane packing).  Cap TB so the grid has
    # >= 4 steps once the batch is large enough, so the "parallel" batch axis is
    # actually split across v7x's two TensorCores.
    B16 = _round_up(B, SUBLANE_BF16)
    TB = min(batch_tile, B16)
    if B16 >= 4 * SUBLANE_BF16 and B16 // TB < 4:
        TB = _round_up(pl.cdiv(B16, 4), SUBLANE_BF16)
    B_p = _round_up(B, TB)

    x = state.astype(jnp.float32)
    if B_p != B:
        # Only the (< TB) tail rows are padded; padded rows are sliced off below.
        x = jnp.pad(x, ((0, B_p - B), (0, 0)))

    grid = (B_p // TB,)

    # Weights/biases: constant index_map -> DMA'd once, VMEM-resident across the
    # whole batch grid while x/out tiles are software-pipelined.
    def const_spec(shape):
        return pl.BlockSpec(shape, lambda i: (0, 0))

    # Rough VMEM footprint: double-buffered x/out streams, resident weights,
    # live f32 intermediates.  Raise the scoped limit only if we approach the
    # smallest default (v5e: 16 MiB scoped; v7x total VMEM is 64 MiB).
    wbytes = jnp.dtype(w1.dtype).itemsize
    est = (2 * TB * D * 4 + 2 * TB * A * 4
           + 2 * (D * H1 + H1 * H2 + H2 * A) * wbytes
           + 2 * (H1 + H2 + A) * 4
           + TB * (H1 + H2) * (4 + wbytes))
    vmem_limit = min(2 * est, 96 << 20) if est > (12 << 20) else None

    out_p = pl.pallas_call(
        dqn_kernel,
        out_shape=jax.ShapeDtypeStruct((B_p, A), jnp.float32),
        grid=grid,
        in_specs=[
            pl.BlockSpec((TB, D), lambda i: (i, 0)),   # x: pipelined over batch
            const_spec((D, H1)), const_spec((1, H1)),
            const_spec((H1, H2)), const_spec((1, H2)),
            const_spec((H2, A)), const_spec((1, A)),
        ],
        out_specs=pl.BlockSpec((TB, A), lambda i: (i, 0)),
        compiler_params=pltpu.CompilerParams(
            # Independent batch tiles -> megacore sharding on v7x.
            dimension_semantics=("parallel",),
            vmem_limit_bytes=vmem_limit,
        ),
    )(x, w1, b1, w2, b2, w3, b3)

    return out_p[:B] if B_p != B else out_p


def init_linear(key, fan_in, fan_out):
    """PyTorch nn.Linear default init: U(-1/sqrt(fan_in), 1/sqrt(fan_in))."""
    kw, kb = jax.random.split(key)
    bound = 1.0 / math.sqrt(fan_in)
    # Stored [in, out] (transpose of PyTorch's [out, in]) so the kernel does x @ W.
    w = jax.random.uniform(kw, (fan_in, fan_out), jnp.float32, -bound, bound)
    b = jax.random.uniform(kb, (fan_out,), jnp.float32, -bound, bound)
    return w, b


def reference_forward(state, params):
    """Pure-JAX reference mirroring the PyTorch forward (highest matmul precision)."""
    hp = jax.lax.Precision.HIGHEST
    h1 = jnp.maximum(jnp.dot(state, params["w1"], precision=hp) + params["b1"], 0.0)
    h2 = jnp.maximum(jnp.dot(h1, params["w2"], precision=hp) + params["b2"], 0.0)
    return jnp.dot(h2, params["w3"], precision=hp) + params["b3"]


if __name__ == "__main__":
    # Shapes consistent with DeepQNetwork(lr, input_dims=(16,), fc1_dims=32,
    # fc2_dims=32, n_actions=8); batch of 8 states.
    batch, input_dims, fc1_dims, fc2_dims, n_actions = 8, 16, 32, 32, 8

    key = jax.random.PRNGKey(0)
    k_x, k1, k2, k3 = jax.random.split(key, 4)

    state = jax.random.normal(k_x, (batch, input_dims), jnp.float32)
    w1, b1 = init_linear(k1, input_dims, fc1_dims)
    w2, b2 = init_linear(k2, fc1_dims, fc2_dims)
    w3, b3 = init_linear(k3, fc2_dims, n_actions)
    params = {"w1": w1, "b1": b1, "w2": w2, "b2": b2, "w3": w3, "b3": b3}

    # One-time preprocessing (f32 MXU path for exact parity with the PyTorch
    # reference; pass compute_dtype=jnp.bfloat16 for the low-precision fast path).
    prepped = prepare_params(params, compute_dtype=jnp.float32)

    fwd = jax.jit(lambda s: dqn_forward(s, prepped))
    actions = jax.block_until_ready(fwd(state))

    ref = reference_forward(state, params)
    assert actions.shape == (batch, n_actions)
    assert bool(jnp.allclose(actions, ref, atol=2e-2, rtol=2e-2)), "mismatch vs reference"
    print("KERNEL_OK")
</pallas_src>

<mosaic_0001>
module attributes {stable_mosaic.version = 11 : i64} {
  func.func @dqn_kernel(%arg0: i32, %arg1: memref<16x16xf32, #tpu.memory_space<vmem>>, %arg2: memref<16x32xf32, #tpu.memory_space<vmem>>, %arg3: memref<1x32xf32, #tpu.memory_space<vmem>>, %arg4: memref<32x32xf32, #tpu.memory_space<vmem>>, %arg5: memref<1x32xf32, #tpu.memory_space<vmem>>, %arg6: memref<32x8xf32, #tpu.memory_space<vmem>>, %arg7: memref<1x8xf32, #tpu.memory_space<vmem>>, %arg8: memref<16x8xf32, #tpu.memory_space<vmem>>) attributes {dimension_semantics = [#tpu.dimension_semantics<parallel>], iteration_bounds = array<i64: 1>, scalar_prefetch = 0 : i64, scratch_operands = 0 : i64, tpu.core_type = #tpu.core_type<tc>, window_params = [{transform_indices = @transform_0, window_bounds = array<i64: 16, 16>}, {pipeline_mode = #tpu.pipeline_mode<synchronous>, transform_indices = @transform_1, window_bounds = array<i64: 16, 32>}, {pipeline_mode = #tpu.pipeline_mode<synchronous>, transform_indices = @transform_2, window_bounds = array<i64: 1, 32>}, {pipeline_mode = #tpu.pipeline_mode<synchronous>, transform_indices = @transform_3, window_bounds = array<i64: 32, 32>}, {pipeline_mode = #tpu.pipeline_mode<synchronous>, transform_indices = @transform_4, window_bounds = array<i64: 1, 32>}, {pipeline_mode = #tpu.pipeline_mode<synchronous>, transform_indices = @transform_5, window_bounds = array<i64: 32, 8>}, {pipeline_mode = #tpu.pipeline_mode<synchronous>, transform_indices = @transform_6, window_bounds = array<i64: 1, 8>}, {transform_indices = @transform_7, window_bounds = array<i64: 16, 8>}]} {
    %c0 = arith.constant 0 : index
    %c0_0 = arith.constant 0 : index
    %0 = vector.load %arg1[%c0, %c0_0] : memref<16x16xf32, #tpu.memory_space<vmem>>, vector<16x16xf32>
    %c0_1 = arith.constant 0 : index
    %c0_2 = arith.constant 0 : index
    %1 = vector.load %arg2[%c0_1, %c0_2] : memref<16x32xf32, #tpu.memory_space<vmem>>, vector<16x32xf32>
    %cst = arith.constant dense<0.000000e+00> : vector<16x32xf32>
    %2 = tpu.matmul %0, %1, %cst {dimension_numbers = #tpu.dot_dimension_numbers<[1], [0], [0], [1], [0, 0, 1, 1], [], []>} : vector<16x16xf32>, vector<16x32xf32>, vector<16x32xf32> -> vector<16x32xf32>
    %c0_3 = arith.constant 0 : index
    %c0_4 = arith.constant 0 : index
    %3 = vector.load %arg3[%c0_3, %c0_4] : memref<1x32xf32, #tpu.memory_space<vmem>>, vector<1x32xf32>
    %4 = vector.broadcast %3 : vector<1x32xf32> to vector<16x32xf32>
    %5 = arith.addf %2, %4 : vector<16x32xf32>
    %cst_5 = arith.constant 0.000000e+00 : f32
    %6 = vector.broadcast %cst_5 : f32 to vector<16x32xf32>
    %7 = arith.maximumf %5, %6 : vector<16x32xf32>
    %c0_6 = arith.constant 0 : index
    %c0_7 = arith.constant 0 : index
    %8 = vector.load %arg4[%c0_6, %c0_7] : memref<32x32xf32, #tpu.memory_space<vmem>>, vector<32x32xf32>
    %cst_8 = arith.constant dense<0.000000e+00> : vector<16x32xf32>
    %9 = tpu.matmul %7, %8, %cst_8 {dimension_numbers = #tpu.dot_dimension_numbers<[1], [0], [0], [1], [0, 0, 1, 1], [], []>} : vector<16x32xf32>, vector<32x32xf32>, vector<16x32xf32> -> vector<16x32xf32>
    %c0_9 = arith.constant 0 : index
    %c0_10 = arith.constant 0 : index
    %10 = vector.load %arg5[%c0_9, %c0_10] : memref<1x32xf32, #tpu.memory_space<vmem>>, vector<1x32xf32>
    %11 = vector.broadcast %10 : vector<1x32xf32> to vector<16x32xf32>
    %12 = arith.addf %9, %11 : vector<16x32xf32>
    %cst_11 = arith.constant 0.000000e+00 : f32
    %13 = vector.broadcast %cst_11 : f32 to vector<16x32xf32>
    %14 = arith.maximumf %12, %13 : vector<16x32xf32>
    %c0_12 = arith.constant 0 : index
    %c0_13 = arith.constant 0 : index
    %15 = vector.load %arg6[%c0_12, %c0_13] : memref<32x8xf32, #tpu.memory_space<vmem>>, vector<32x8xf32>
    %cst_14 = arith.constant dense<0.000000e+00> : vector<16x8xf32>
    %16 = tpu.matmul %14, %15, %cst_14 {dimension_numbers = #tpu.dot_dimension_numbers<[1], [0], [0], [1], [0, 0, 1, 1], [], []>} : vector<16x32xf32>, vector<32x8xf32>, vector<16x8xf32> -> vector<16x8xf32>
    %c0_15 = arith.constant 0 : index
    %c0_16 = arith.constant 0 : index
    %17 = vector.load %arg7[%c0_15, %c0_16] : memref<1x8xf32, #tpu.memory_space<vmem>>, vector<1x8xf32>
    %18 = vector.broadcast %17 : vector<1x8xf32> to vector<16x8xf32>
    %19 = arith.addf %16, %18 : vector<16x8xf32>
    %c0_17 = arith.constant 0 : index
    %c0_18 = arith.constant 0 : index
    %20 = vector.load %arg8[%c0_17, %c0_18] : memref<16x8xf32, #tpu.memory_space<vmem>>, vector<16x8xf32>
    tpu.vector_store %arg8[%c0_17, %c0_18], %19 {strides = array<i32>} : memref<16x8xf32, #tpu.memory_space<vmem>>, vector<16x8xf32>,
    return
  }
  func.func @transform_0(%arg0: i32) -> (i32, i32) {
    %c0_i32 = arith.constant 0 : i32
    %c0_i32_0 = arith.constant 0 : i32
    return %arg0, %c0_i32 : i32, i32
  }
  func.func @transform_1(%arg0: i32) -> (i32, i32) {
    %c0_i32 = arith.constant 0 : i32
    %c0_i32_0 = arith.constant 0 : i32
    %c0_i32_1 = arith.constant 0 : i32
    return %c0_i32, %c0_i32_0 : i32, i32
  }
  func.func @transform_2(%arg0: i32) -> (i32, i32) {
    %c0_i32 = arith.constant 0 : i32
    %c0_i32_0 = arith.constant 0 : i32
    %c0_i32_1 = arith.constant 0 : i32
    return %c0_i32, %c0_i32_0 : i32, i32
  }
  func.func @transform_3(%arg0: i32) -> (i32, i32) {
    %c0_i32 = arith.constant 0 : i32
    %c0_i32_0 = arith.constant 0 : i32
    %c0_i32_1 = arith.constant 0 : i32
    return %c0_i32, %c0_i32_0 : i32, i32
  }
  func.func @transform_4(%arg0: i32) -> (i32, i32) {
    %c0_i32 = arith.constant 0 : i32
    %c0_i32_0 = arith.constant 0 : i32
    %c0_i32_1 = arith.constant 0 : i32
    return %c0_i32, %c0_i32_0 : i32, i32
  }
  func.func @transform_5(%arg0: i32) -> (i32, i32) {
    %c0_i32 = arith.constant 0 : i32
    %c0_i32_0 = arith.constant 0 : i32
    %c0_i32_1 = arith.constant 0 : i32
    return %c0_i32, %c0_i32_0 : i32, i32
  }
  func.func @transform_6(%arg0: i32) -> (i32, i32) {
    %c0_i32 = arith.constant 0 : i32
    %c0_i32_0 = arith.constant 0 : i32
    %c0_i32_1 = arith.constant 0 : i32
    return %c0_i32, %c0_i32_0 : i32, i32
  }
  func.func @transform_7(%arg0: i32) -> (i32, i32) {
    %c0_i32 = arith.constant 0 : i32
    %c0_i32_0 = arith.constant 0 : i32
    return %arg0, %c0_i32 : i32, i32
  }
}

</mosaic_0001>

<bundles_post_ra>
// kernel: _lambda_.1
= control target key start
LH: loop header
LB: loop body
LE: loop exit
PB: predicated region body
PF: predicated region fallthrough
CT: control target
= control target key end

     0   :  { %12 = vsyncpa [#allocation3], 0  ;;  %s334_s0 = inlined_call_operand.vmem [shape: f32[16,16], index: 0, kind: input, shape index: {}]   ;;  %s335_s1 = inlined_call_operand.vmem [shape: f32[16,32], index: 1, kind: input, shape index: {}]   ;;  %s336_s2 = inlined_call_operand.vmem [shape: f32[1,32], index: 2, kind: input, shape index: {}]   ;;  %s337_s3 = inlined_call_operand.hbm [shape: f32[32,32], index: 3, kind: input, shape index: {}]   ;;  %s338_s4 = inlined_call_operand.vmem [shape: f32[1,32], index: 4, kind: input, shape index: {}]   ;;  %s339_s5 = inlined_call_operand.hbm [shape: f32[32,8], index: 5, kind: input, shape index: {}]   ;;  %s340_s6 = inlined_call_operand.vmem [shape: f32[1,8], index: 6, kind: input, shape index: {}]   ;;  %s341_s7 = inlined_call_operand.vmem [shape: f32[16,8], index: 7, kind: output, shape index: {}]  }
   0x1   :  { %s24_s26 = sshll.u32 %s337_s3, 4  ;;  %s25_s26 = int_to_ptr.hbm [resolvable:$true] %s24_s26 }
   0x2   :  { %13 = vsyncpa [#allocation5], 0  ;;  %s253_s27 = smov [#allocation2]   ;;  %s39_s8 = sshll.u32 %s339_s5, 4  ;;  %s40_s8 = int_to_ptr.hbm [resolvable:$true] %s39_s8 }
   0x3   :  { %s26_s28 = sshll.u32 %s253_s27, 4  ;;  %s254_s9 = smov 128   ;;  %s27_s28 = int_to_ptr.vmem [resolvable:$true] %s26_s28 }
   0x4   :  { %s255_s10 = smov 8   ;;  %s256_s11 = smov [#allocation4]  }
   0x5   :  { %32 = dma.hbm_to_vmem [thread:$0]  %s25_s26, 512, %s27_s28, [#allocation3], %s254_s9, %s254_s9, %s255_s10  }
   0x6   :  { %s41_s12 = sshll.u32 %s256_s11, 4  ;;  %s42_s12 = int_to_ptr.vmem [resolvable:$true] %s41_s12 }
   0x7   :  { %47 = dma.hbm_to_vmem [thread:$0]  %s40_s8, 512, %s42_s12, [#allocation5], %s254_s9, %s254_s9, %s255_s10  }
   0x8   :  { %249 = dma.done.wait [#allocation3], 512  }
   0x9   :  { %250 = vsyncadd [#allocation3], 4294966784 }
   0xa   :  { %251 = dma.done.wait [#allocation5], 512  }
   0xb   :  { %252 = vsyncadd [#allocation5], 4294966784  ;;  %v61_v0 = vld [vmem:[%s335_s1 + $0x8] sm:$0xff]  ;;  %v60_v1 = vld [vmem:[%s335_s1] sm:$0xff]  ;;  %vm66_vm0 = vcmask 130048   ;;  %vm106_vm1 = vcmask 261120  }
   0xc   :  { %87 = vmatpush.msra.mxu0 %v61_v0  ;;  %v58_v2 = vld [vmem:[%s334_s0] sm:$0xff]  ;;  %v101_v3 = vld [vmem:[#allocation2 + $0x18] sm:$0xff]  ;;  %v59_v4 = vld [vmem:[%s334_s0 + $0x8] sm:$0xff]  ;;  %vm175_vm2 = vcmask 64512  }
   0xd   :  { %125 = vmatpush.msra.mxu1 %v101_v3  ;;  %190 = vmatpush.msra.mxu3 %v101_v3  ;;  %v100_v5 = vld [vmem:[#allocation2 + $0x10] sm:$0xff]  ;;  %v99_v6 = vld [vmem:[#allocation2 + $0x8] sm:$0xff]  ;;  %v98_v7 = vld [vmem:[#allocation2] sm:$0xff] }
   0xe   :  { %88 = vmatpush.msra.mxu0 %v60_v1  ;;  %v141_v8 = vld [vmem:[#allocation4 + $0x18] sm:$0xff]  ;;  %v198_v9 = vld [vmem:[%s336_s2] ss:$0 sm:$0xff]  ;;  %v140_v16 = vld [vmem:[#allocation4 + $0x10] sm:$0xff] }
   0xf   :  { %184 = vmatmul.msk.f32.vlgmr.msra.gmra.mxu0 %vm66_vm0, %v58_v2  ;;  %126 = vmatpush.msra.mxu1 %v100_v5  ;;  %v139_v17 = vld [vmem:[#allocation4 + $0x8] sm:$0xff]  ;;  %v138_v18 = vld [vmem:[#allocation4] sm:$0xff] }
  0x10   :  { %191 = vmatpush.msra.mxu3 %v100_v5  ;;  %164 = vmatpush.msra.mxu2 %v141_v8  ;;  %v199_v19 = vld [vmem:[%s338_s4] ss:$0 sm:$0xff] }
  0x11   :  { %127 = vmatpush.msra.mxu1 %v99_v6  ;;  %v200_v26 = vld [vmem:[%s340_s6] ss:$0 sm:$0xff] }
  0x12   :  { %192 = vmatpush.msra.mxu3 %v99_v6  ;;  %165 = vmatpush.msra.mxu2 %v140_v16 }
  0x13   :  { %128 = vmatpush.msra.mxu1 %v98_v7 }
  0x14   :  { %193 = vmatpush.msra.mxu3 %v98_v7  ;;  %166 = vmatpush.msra.mxu2 %v139_v17 }
  0x16   :  { %167 = vmatpush.msra.mxu2 %v138_v18 }
  0x17   :  { %185 = vmatmul.msk.f32.gmra.mxu0 %vm66_vm0, %v59_v4 }
  0x8c   :  { %v90_v10 = vpop.f32.mrf.mxu0 }
  0x8d   :  { %v91_v11 = vadd.f32 %v198_v9, %v90_v10 }
  0x8f   :  { %v96_v12 = vmax.f32 %v91_v11, 0.0 }
  0x91   :  { %186 = vmatmul.msk.f32.vlgmr.msra.gmra.mxu1 %vm106_vm1, %v96_v12 }
  0x94   :  { %v93_v13 = vpop.f32.mrf.mxu0 }
  0x95   :  { %v94_v14 = vadd.f32 %v198_v9, %v93_v13 }
  0x97   :  { %v97_v15 = vmax.f32 %v94_v14, 0.0 }
  0x99   :  { %187 = vmatmul.msk.f32.vlgmr.msra.gmra.mxu3 %vm106_vm1, %v97_v15 }
 0x10e   :  { %v130_v20 = vpop.f32.mrf.mxu1 }
 0x10f   :  { %v131_v21 = vadd.f32 %v199_v19, %v130_v20 }
 0x111   :  { %v136_v22 = vmax.f32 %v131_v21, 0.0 }
 0x113   :  { %188 = vmatmul.msk.f32.vlgmr.msra.gmra.mxu2 %vm106_vm1, %v136_v22 }
 0x11c   :  { %v133_v23 = vpop.f32.mrf.mxu3 }
 0x11d   :  { %v134_v24 = vadd.f32 %v199_v19, %v133_v23 }
 0x11f   :  { %v137_v25 = vmax.f32 %v134_v24, 0.0 }
 0x121   :  { %189 = vmatmul.msk.f32.gmra.mxu2 %vm106_vm1, %v137_v25 }
 0x196   :  { %v169_v27 = vpop.f32.mrf.mxu2 }
 0x197   :  { %v170_v28 = vadd.f32 %v200_v26, %v169_v27 }
 0x199   :  { %176 = vst.msk [vmem:[%s341_s7] sm:$0xff] %vm175_vm2, %v170_v28 }
 0x1a4   :  { %v172_v29 = vpop.f32.mrf.mxu2 }
 0x1a5   :  { %v173_v30 = vadd.f32 %v200_v26, %v172_v29 }
 0x1a7   :  { %177 = vst.msk [vmem:[%s341_s7 + $0x8] sm:$0xff] %vm175_vm2, %v173_v30 }
 0x1a8   :  { %182 = vsyncpa [#allocation3], 1 }
 0x1a9   :  { %183 = vsyncpa [#allocation5], 1 }

</bundles_post_ra>
